<compile_context>
chip_gen: v5e
topology: v5e:2x2
jax: 0.10.0
libtpu: 0.0.40
codegen_flags: <defaults>
</compile_context>

<pallas_src>
import functools

import numpy as np
import jax
import jax.numpy as jnp
from jax.experimental import pallas as pl
from jax.experimental.pallas import tpu as pltpu

# Constants mirroring the PyTorch module
HIDDEN_NEURONS_LAYOUT = [5]
NEURON_COUNT = 50
STEPS = 3


def _round_up(x, m):
    return ((x + m - 1) // m) * m


# ---------------------------------------------------------------------------
# Parameter construction (deterministic re-implementation of Brain._initMLP).
# Builds a dense synapse matrix W[from, to], a full-length bias vector (zeros
# at input slots) and a {0,1} non-output mask.
# ---------------------------------------------------------------------------
def build_mlp_brain_params(key, input_size, output_size):
    n = input_size + sum(HIDDEN_NEURONS_LAYOUT) + output_size
    assert n == NEURON_COUNT, "MLP layout must match NEURON_COUNT"

    current = 0
    input_idx = np.arange(current, current + input_size); current += input_size
    hidden_idx = []
    for ls in HIDDEN_NEURONS_LAYOUT:
        hidden_idx.append(np.arange(current, current + ls)); current += ls
    output_idx = np.arange(current, current + output_size)

    froms, tos = [], []
    for i in input_idx:
        for j in hidden_idx[0]:
            froms.append(int(i)); tos.append(int(j))
    for h1, h2 in zip(hidden_idx[:-1], hidden_idx[1:]):
        for i in h1:
            for j in h2:
                froms.append(int(i)); tos.append(int(j))
    for i in hidden_idx[-1]:
        for j in output_idx:
            froms.append(int(i)); tos.append(int(j))

    k_w, k_b = jax.random.split(key)
    weights = jax.random.normal(k_w, (len(froms),), dtype=jnp.float32)
    W = jnp.zeros((n, n), jnp.float32).at[jnp.array(froms), jnp.array(tos)].set(weights)

    biases = jax.random.normal(k_b, (n - input_size,), dtype=jnp.float32)
    b_full = jnp.zeros((n,), jnp.float32).at[input_size:].set(biases)

    non_output = jnp.ones((n,), jnp.float32).at[jnp.array(output_idx)].set(0.0)
    return W, b_full, non_output, n


# ---------------------------------------------------------------------------
# Kernel: full STEPS-long recurrence (matmul + gated bias + gated tanh) on one
# (TB, n_pad) state tile, with a compact transposed writeback.
#   x_ref : (TB, k_in)            input lanes only (zero past input_size)
#   w_ref : (n_pad + 16, n_pad)   rows [0, n_pad) = W; row n_pad = bias;
#                                 row n_pad + 8 = non_output mask
#   o_ref : (8, TB)               row r = neuron (out_start + r), batch on lanes
# ---------------------------------------------------------------------------
def brain_kernel(x_ref, w_ref, o_ref, *, n_pad, k_in, out_start, steps):
    x = x_ref[...]
    w_in = w_ref[0:k_in, :]            # only rows that can be non-zero at step 1
    w = w_ref[0:n_pad, :]
    b_row = w_ref[n_pad:n_pad + 1, :]
    m_row = w_ref[n_pad + 8:n_pad + 9, :]

    # Step 1: the initial state is [x, 0, ...], so contract only the first k_in
    # rows of W (no zero-padded state ever touches HBM or VMEM).
    values = jnp.dot(x, w_in, preferred_element_type=jnp.float32)
    tb = values.shape[0]

    # Hoisted, loop-invariant broadcasts (bias is zero at input lanes + padding,
    # so the original non_input gating is implicit).
    bias = jnp.broadcast_to(b_row, (tb, n_pad))
    non_output = jnp.broadcast_to(m_row, (tb, n_pad)) > 0.5

    def epilogue(nxt):
        nxt = nxt + jnp.where(jnp.abs(nxt) > 1e-6, bias, 0.0)
        act = (jnp.abs(nxt) > 1e-6) & non_output
        return jnp.where(act, jnp.tanh(nxt), nxt)

    values = epilogue(values)
    for _ in range(steps - 1):
        values = epilogue(jnp.dot(values, w, preferred_element_type=jnp.float32))

    # Compact transposed output via an exact 0/1 selection matmul:
    #   out[r, b] = values[b, out_start + r]   (rows beyond output_size read
    #   zero-padded lanes and stay exactly zero).
    r_ids = jax.lax.broadcasted_iota(jnp.int32, (o_ref.shape[0], n_pad), 0)
    c_ids = jax.lax.broadcasted_iota(jnp.int32, (o_ref.shape[0], n_pad), 1)
    p_sel = (c_ids == r_ids + out_start).astype(jnp.float32)
    o_ref[...] = jax.lax.dot_general(
        p_sel, values, (((1,), (1,)), ((), ())),
        preferred_element_type=jnp.float32)


def _pick_batch_tile(b_pad, max_tile=1024):
    """Largest multiple-of-128 divisor of b_pad that is <= max_tile, preferring a
    choice that leaves >= 2 grid steps (keeps v7x's second TensorCore busy)."""
    cands = [t for t in range(128, min(max_tile, b_pad) + 1, 128) if b_pad % t == 0]
    two_step = [t for t in cands if b_pad // t >= 2]
    pool = two_step or cands or [b_pad]
    return max(pool)


def brain_forward(x, W, b_full, non_output, n, input_size, output_size,
                  *, max_tile=1024, small_batch_max=256):
    B = x.shape[0]
    n_pad = max(128, _round_up(n, 128))
    k_in = _round_up(input_size, 8)
    out_start = n - output_size

    # The kernel relies on the bias being exactly zero at input lanes and on all
    # padding of W / bias / mask being exactly zero (keeps padded lanes at zero
    # through the recurrence). Re-zero explicitly so imported params stay safe.
    b_safe = jnp.asarray(b_full, jnp.float32).at[:input_size].set(0.0)

    w_ext = (jnp.zeros((n_pad + 16, n_pad), jnp.float32)
             .at[:n, :n].set(W)
             .at[n_pad, :n].set(b_safe)
             .at[n_pad + 8, :n].set(non_output))

    kernel = functools.partial(brain_kernel, n_pad=n_pad, k_in=k_in,
                               out_start=out_start, steps=STEPS)

    if B <= small_batch_max:
        # Latency floor: one grid-free call, full-array VMEM blocks, 2 operands.
        b_pad = max(8, _round_up(B, 8))
        x_p = jnp.zeros((b_pad, k_in), jnp.float32).at[:B, :input_size].set(x)
        vmem = pl.BlockSpec(memory_space=pltpu.MemorySpace.VMEM)
        out_c = pl.pallas_call(
            kernel,
            out_shape=jax.ShapeDtypeStruct((8, b_pad), jnp.float32),
            in_specs=[vmem, vmem],
            out_specs=vmem,
        )(x_p, w_ext)
    else:
        # Streaming path: batch padded only to 128 (not to the tile); W/bias/mask
        # stay VMEM-resident via a constant index_map; batch axis is "parallel".
        b_pad = _round_up(B, 128)
        tile = _pick_batch_tile(b_pad, max_tile)
        x_p = jnp.zeros((b_pad, k_in), jnp.float32).at[:B, :input_size].set(x)
        out_c = pl.pallas_call(
            kernel,
            out_shape=jax.ShapeDtypeStruct((8, b_pad), jnp.float32),
            grid=(b_pad // tile,),
            in_specs=[
                pl.BlockSpec((tile, k_in), lambda i: (i, 0)),
                pl.BlockSpec((n_pad + 16, n_pad), lambda i: (0, 0)),
            ],
            out_specs=pl.BlockSpec((8, tile), lambda i: (0, i)),
            compiler_params=pltpu.CompilerParams(
                dimension_semantics=("parallel",)),
        )(x_p, w_ext)

    # TODO(synk): if profiling at very large tiles shows the MXU as the binder,
    # cast the matmul operands to bfloat16 (keep f32 accumulation); kept in f32
    # here so the |x|>1e-6 gates track the PyTorch reference closely.
    return out_c[:output_size, :B].T


# Pure-JAX reference for correctness checking (matches the PyTorch step()).
def brain_forward_ref(x, W, b_full, non_output, n, input_size, output_size):
    B = x.shape[0]
    values = jnp.zeros((B, n), jnp.float32).at[:, :input_size].set(x)
    for _ in range(STEPS):
        nxt = jnp.dot(values, W, precision=jax.lax.Precision.HIGHEST)
        nxt = nxt + jnp.where(jnp.abs(nxt) > 1e-6, b_full, 0.0)
        act = (jnp.abs(nxt) > 1e-6) & (non_output > 0.5)
        nxt = jnp.where(act, jnp.tanh(nxt), nxt)
        values = nxt
    return values[:, n - output_size:]


if __name__ == "__main__":
    # TODO(synk): the 'spatial' init strategy (multinomial sampling + BFS
    # trimToMinimalPaths) and the host-side activation_history logging have no
    # clean Pallas equivalent; only the 'mlp' init + forward recurrence is done.
    input_size, output_size = 41, 4        # 41 + 5 + 4 == NEURON_COUNT (50)

    key = jax.random.PRNGKey(0)
    k_params, k_x, k_x2 = jax.random.split(key, 3)
    W, b_full, non_output, n = build_mlp_brain_params(k_params, input_size, output_size)

    # Small-batch path (grid-free single VMEM block, 2 operands).
    batch = 2
    x = jax.random.normal(k_x, (batch, input_size), dtype=jnp.float32)
    out = jax.block_until_ready(
        brain_forward(x, W, b_full, non_output, n, input_size, output_size))
    ref = brain_forward_ref(x, W, b_full, non_output, n, input_size, output_size)
    assert out.shape == (batch, output_size)
    np.testing.assert_allclose(np.asarray(out), np.asarray(ref), rtol=2e-3, atol=2e-3)

    # Batch-tiled path (parallel grid over batch, W/bias/mask VMEM-resident,
    # compact transposed writeback). B=320 -> B_pad=384, tile=128, 3 grid steps.
    big_batch = 320
    x2 = jax.random.normal(k_x2, (big_batch, input_size), dtype=jnp.float32)
    out2 = jax.block_until_ready(
        brain_forward(x2, W, b_full, non_output, n, input_size, output_size))
    ref2 = brain_forward_ref(x2, W, b_full, non_output, n, input_size, output_size)
    assert out2.shape == (big_batch, output_size)
    np.testing.assert_allclose(np.asarray(out2), np.asarray(ref2), rtol=2e-3, atol=2e-3)

    print("KERNEL_OK")
</pallas_src>

<mosaic_0001>
module attributes {stable_mosaic.version = 11 : i64} {
  func.func @brain_kernel(%arg0: memref<8x48xf32, #tpu.memory_space<vmem>>, %arg1: memref<144x128xf32, #tpu.memory_space<vmem>>, %arg2: memref<8x8xf32, #tpu.memory_space<vmem>>) attributes {dimension_semantics = [], scalar_prefetch = 0 : i64, scratch_operands = 0 : i64, tpu.core_type = #tpu.core_type<tc>} {
    %c0 = arith.constant 0 : index
    %c0_0 = arith.constant 0 : index
    %0 = vector.load %arg0[%c0, %c0_0] : memref<8x48xf32, #tpu.memory_space<vmem>>, vector<8x48xf32>
    %c0_1 = arith.constant 0 : index
    %c0_2 = arith.constant 0 : index
    %1 = vector.load %arg1[%c0_1, %c0_2] : memref<144x128xf32, #tpu.memory_space<vmem>>, vector<48x128xf32>
    %c0_3 = arith.constant 0 : index
    %c0_4 = arith.constant 0 : index
    %2 = vector.load %arg1[%c0_3, %c0_4] : memref<144x128xf32, #tpu.memory_space<vmem>>, vector<128x128xf32>
    %c128 = arith.constant 128 : index
    %c0_5 = arith.constant 0 : index
    %3 = vector.load %arg1[%c128, %c0_5] : memref<144x128xf32, #tpu.memory_space<vmem>>, vector<1x128xf32>
    %c136 = arith.constant 136 : index
    %c0_6 = arith.constant 0 : index
    %4 = vector.load %arg1[%c136, %c0_6] : memref<144x128xf32, #tpu.memory_space<vmem>>, vector<1x128xf32>
    %cst = arith.constant dense<0.000000e+00> : vector<8x128xf32>
    %5 = tpu.matmul %0, %1, %cst {dimension_numbers = #tpu.dot_dimension_numbers<[1], [0], [0], [1], [0, 0, 1, 1], [], []>} : vector<8x48xf32>, vector<48x128xf32>, vector<8x128xf32> -> vector<8x128xf32>
    %6 = vector.shape_cast %3 : vector<1x128xf32> to vector<1x128xf32>
    %7 = vector.broadcast %6 : vector<1x128xf32> to vector<8x128xf32>
    %8 = vector.shape_cast %4 : vector<1x128xf32> to vector<1x128xf32>
    %9 = vector.broadcast %8 : vector<1x128xf32> to vector<8x128xf32>
    %cst_7 = arith.constant 5.000000e-01 : f32
    %10 = vector.broadcast %cst_7 : f32 to vector<8x128xf32>
    %11 = arith.cmpf ogt, %9, %10 : vector<8x128xf32>
    %12 = math.absf %5 : vector<8x128xf32>
    %cst_8 = arith.constant 9.99999997E-7 : f32
    %13 = vector.broadcast %cst_8 : f32 to vector<8x128xf32>
    %14 = arith.cmpf ogt, %12, %13 : vector<8x128xf32>
    %cst_9 = arith.constant 0.000000e+00 : f32
    %15 = vector.broadcast %cst_9 : f32 to vector<8x128xf32>
    %16 = arith.select %14, %7, %15 : vector<8x128xi1>, vector<8x128xf32>
    %17 = arith.addf %5, %16 : vector<8x128xf32>
    %18 = math.absf %17 : vector<8x128xf32>
    %cst_10 = arith.constant 9.99999997E-7 : f32
    %19 = vector.broadcast %cst_10 : f32 to vector<8x128xf32>
    %20 = arith.cmpf ogt, %18, %19 : vector<8x128xf32>
    %21 = arith.andi %20, %11 : vector<8x128xi1>
    %22 = math.tanh %17 : vector<8x128xf32>
    %23 = arith.select %21, %22, %17 : vector<8x128xi1>, vector<8x128xf32>
    %cst_11 = arith.constant dense<0.000000e+00> : vector<8x128xf32>
    %24 = tpu.matmul %23, %2, %cst_11 {dimension_numbers = #tpu.dot_dimension_numbers<[1], [0], [0], [1], [0, 0, 1, 1], [], []>} : vector<8x128xf32>, vector<128x128xf32>, vector<8x128xf32> -> vector<8x128xf32>
    %25 = math.absf %24 : vector<8x128xf32>
    %cst_12 = arith.constant 9.99999997E-7 : f32
    %26 = vector.broadcast %cst_12 : f32 to vector<8x128xf32>
    %27 = arith.cmpf ogt, %25, %26 : vector<8x128xf32>
    %cst_13 = arith.constant 0.000000e+00 : f32
    %28 = vector.broadcast %cst_13 : f32 to vector<8x128xf32>
    %29 = arith.select %27, %7, %28 : vector<8x128xi1>, vector<8x128xf32>
    %30 = arith.addf %24, %29 : vector<8x128xf32>
    %31 = math.absf %30 : vector<8x128xf32>
    %cst_14 = arith.constant 9.99999997E-7 : f32
    %32 = vector.broadcast %cst_14 : f32 to vector<8x128xf32>
    %33 = arith.cmpf ogt, %31, %32 : vector<8x128xf32>
    %34 = arith.andi %33, %11 : vector<8x128xi1>
    %35 = math.tanh %30 : vector<8x128xf32>
    %36 = arith.select %34, %35, %30 : vector<8x128xi1>, vector<8x128xf32>
    %cst_15 = arith.constant dense<0.000000e+00> : vector<8x128xf32>
    %37 = tpu.matmul %36, %2, %cst_15 {dimension_numbers = #tpu.dot_dimension_numbers<[1], [0], [0], [1], [0, 0, 1, 1], [], []>} : vector<8x128xf32>, vector<128x128xf32>, vector<8x128xf32> -> vector<8x128xf32>
    %38 = math.absf %37 : vector<8x128xf32>
    %cst_16 = arith.constant 9.99999997E-7 : f32
    %39 = vector.broadcast %cst_16 : f32 to vector<8x128xf32>
    %40 = arith.cmpf ogt, %38, %39 : vector<8x128xf32>
    %cst_17 = arith.constant 0.000000e+00 : f32
    %41 = vector.broadcast %cst_17 : f32 to vector<8x128xf32>
    %42 = arith.select %40, %7, %41 : vector<8x128xi1>, vector<8x128xf32>
    %43 = arith.addf %37, %42 : vector<8x128xf32>
    %44 = math.absf %43 : vector<8x128xf32>
    %cst_18 = arith.constant 9.99999997E-7 : f32
    %45 = vector.broadcast %cst_18 : f32 to vector<8x128xf32>
    %46 = arith.cmpf ogt, %44, %45 : vector<8x128xf32>
    %47 = arith.andi %46, %11 : vector<8x128xi1>
    %48 = math.tanh %43 : vector<8x128xf32>
    %49 = arith.select %47, %48, %43 : vector<8x128xi1>, vector<8x128xf32>
    %50 = tpu.iota {dimensions = array<i32: 0>} : vector<8x128xi32>
    %51 = tpu.iota {dimensions = array<i32: 1>} : vector<8x128xi32>
    %c46_i32 = arith.constant 46 : i32
    %52 = vector.broadcast %c46_i32 : i32 to vector<8x128xi32>
    %53 = arith.addi %50, %52 : vector<8x128xi32>
    %54 = arith.cmpi eq, %51, %53 : vector<8x128xi32>
    %55 = arith.extui %54 : vector<8x128xi1> to vector<8x128xi32>
    %56 = arith.sitofp %55 : vector<8x128xi32> to vector<8x128xf32>
    %cst_19 = arith.constant dense<0.000000e+00> : vector<8x8xf32>
    %57 = tpu.matmul %56, %49, %cst_19 {dimension_numbers = #tpu.dot_dimension_numbers<[1], [1], [0], [0], [0, 0, 1, 0], [], []>} : vector<8x128xf32>, vector<8x128xf32>, vector<8x8xf32> -> vector<8x8xf32>
    %c0_20 = arith.constant 0 : index
    %c0_21 = arith.constant 0 : index
    %58 = vector.load %arg2[%c0_20, %c0_21] : memref<8x8xf32, #tpu.memory_space<vmem>>, vector<8x8xf32>
    tpu.vector_store %arg2[%c0_20, %c0_21], %57 {strides = array<i32>} : memref<8x8xf32, #tpu.memory_space<vmem>>, vector<8x8xf32>,
    return
  }
}

</mosaic_0001>

<bundles_post_ra>
// kernel: tpu_custom_call.1
= control target key start
LH: loop header
LB: loop body
LE: loop exit
PB: predicated region body
PF: predicated region fallthrough
CT: control target
= control target key end

     0   :  { %7 = vsyncpa [#allocation3], 0  ;;  %s331_s0 = inlined_call_operand.hbm [shape: f32[8,48], index: 0, kind: input, shape index: {}]   ;;  %s332_s1 = inlined_call_operand.hbm [shape: f32[144,128], index: 1, kind: input, shape index: {}]   ;;  %s333_s2 = inlined_call_operand.hbm [shape: f32[8,8], index: 2, kind: output, shape index: {}]  }
   0x1   :  { %8 = vsyncpa [#allocation6], 0 }
   0x2   :  { %9 = vsyncpa [#allocation4], 0  ;;  %s15_s11 = sshll.u32 %s331_s0, 4  ;;  %s298_s12 = smov [#allocation2]   ;;  %s16_s11 = int_to_ptr.hbm [resolvable:$true] %s15_s11 }
   0x3   :  { %s17_s13 = sshll.u32 %s298_s12, 4  ;;  %s25_s16 = sshll.u32 %s332_s1, 4  ;;  %s18_s13 = int_to_ptr.vmem [resolvable:$true] %s17_s13  ;;  %s26_s16 = int_to_ptr.hbm [resolvable:$true] %s25_s16 }
   0x4   :  { %20 = dma.hbm_to_vmem [thread:$0]  %s16_s11, 128, %s18_s13, [#allocation3]  }
   0x5   :  { %s299_s17 = smov [#allocation5]   ;;  %s300_s19 = smov 128  }
   0x6   :  { %s27_s18 = sshll.u32 %s299_s17, 4  ;;  %s301_s20 = smov 8   ;;  %s28_s18 = int_to_ptr.vmem [resolvable:$true] %s27_s18 }
   0x7   :  { %33 = dma.hbm_to_vmem [thread:$0]  %s26_s16, 2304, %s28_s18, [#allocation6], %s300_s19, %s300_s19, %s301_s20  }
   0x8   :  { %292 = dma.done.wait [#allocation3], 128  }
   0x9   :  { %293 = vsyncadd [#allocation3], 4294967168 }
   0xa   :  { %294 = dma.done.wait [#allocation6], 2304  }
   0xb   :  { %295 = vsyncadd [#allocation6], 4294964992  ;;  %v48_v0 = vld [vmem:[#allocation5 + $0x28] sm:$0xff]  ;;  %v47_v1 = vld [vmem:[#allocation5 + $0x20] sm:$0xff]  ;;  %vm61_vm0 = vcmask 392192   ;;  %v155_v35 = vlaneseq  ;;  %v302_v44 = vmov 1.0  }
   0xc   :  { %75 = vmatpush.msra.mxu0 %v48_v0  ;;  %v46_v2 = vld [vmem:[#allocation5 + $0x18] sm:$0xff]  ;;  %v57_v4 = vld [vmem:[#allocation5 + $0x70] sm:$0xff]  ;;  %v56_v6 = vld [vmem:[#allocation5 + $0x68] sm:$0xff]  ;;  %s303_s0 = smov [#allocation7]   ;;  %s192_s23 = sshll.u32 %s333_s2, 4  ;;  %vm183_vm12 = vcmask 64512   ;;  %s193_s23 = int_to_ptr.hbm [resolvable:$true] %s192_s23 }
   0xd   :  { %v58_v3 = vld [vmem:[#allocation5 + $0x78] sm:$0xff]  ;;  %v45_v5 = vld [vmem:[#allocation5 + $0x10] sm:$0xff]  ;;  %v44_v7 = vld [vmem:[#allocation5 + $0x8] sm:$0xff]  ;;  %v156_v39 = vshrl.u32 %v155_v35, 7  ;;  %v158_v40 = vand.u32 127, %v155_v35  ;;  %s190_s1 = sshll.u32 %s303_s0, 4  ;;  %s191_s1 = int_to_ptr.vmem [resolvable:$true] %s190_s1 }
   0xe   :  { %76 = vmatpush.msra.mxu0 %v47_v1  ;;  %97 = vmatpush.msra.mxu1 %v58_v3  ;;  %v55_v8 = vld [vmem:[#allocation5 + $0x60] sm:$0xff]  ;;  %v54_v10 = vld [vmem:[#allocation5 + $0x58] sm:$0xff]  ;;  %v53_v12 = vld [vmem:[#allocation5 + $0x50] sm:$0xff] }
   0xf   :  { %126 = vmatpush.msra.mxu2 %v58_v3  ;;  %v43_v9 = vld [vmem:[#allocation5] sm:$0xff]  ;;  %v42_v11 = vld [vmem:[#allocation2] sm:$0xff]  ;;  %v52_v13 = vld [vmem:[#allocation5 + $0x48] sm:$0xff]  ;;  %v159_v41 = vadd.s32 46, %v156_v39 }
  0x10   :  { %77 = vmatpush.msra.mxu0 %v46_v2  ;;  %98 = vmatpush.msra.mxu1 %v57_v4  ;;  %v51_v14 = vld [vmem:[#allocation5 + $0x40] sm:$0xff]  ;;  %v50_v15 = vld [vmem:[#allocation5 + $0x38] sm:$0xff]  ;;  %v49_v16 = vld [vmem:[#allocation5 + $0x30] sm:$0xff] }
  0x11   :  { %127 = vmatpush.msra.mxu2 %v57_v4  ;;  %v212_v18 = vld [vmem:[#allocation5 + $0x80] ss:$0 sm:$0xff]  ;;  %v213_v22 = vld [vmem:[#allocation5 + $0x88] ss:$0 sm:$0xff]  ;;  %vm160_vm11 = vcmp.eq.s32.totalorder %v158_v40, %v159_v41 }
  0x12   :  { %78 = vmatpush.msra.mxu0 %v45_v5  ;;  %99 = vmatpush.msra.mxu1 %v56_v6  ;;  %vm87_vm2 = vcmp.gt.f32.partialorder %v213_v22, 0.5 }
  0x13   :  { %128 = vmatpush.msra.mxu2 %v56_v6 }
  0x14   :  { %79 = vmatpush.msra.mxu0 %v44_v7  ;;  %100 = vmatpush.msra.mxu1 %v55_v8 }
  0x15   :  { %129 = vmatpush.msra.mxu2 %v55_v8 }
  0x16   :  { %80 = vmatpush.msra.mxu0 %v43_v9  ;;  %101 = vmatpush.msra.mxu1 %v54_v10 }
  0x17   :  { %203 = vmatmul.msk.f32.vlgmr.msra.gmra.mxu0 %vm61_vm0, %v42_v11  ;;  %130 = vmatpush.msra.mxu2 %v54_v10 }
  0x18   :  { %102 = vmatpush.msra.mxu1 %v53_v12 }
  0x19   :  { %131 = vmatpush.msra.mxu2 %v53_v12 }
  0x1a   :  { %103 = vmatpush.msra.mxu1 %v52_v13 }
  0x1b   :  { %132 = vmatpush.msra.mxu2 %v52_v13 }
  0x1c   :  { %104 = vmatpush.msra.mxu1 %v51_v14 }
  0x1d   :  { %133 = vmatpush.msra.mxu2 %v51_v14 }
  0x1e   :  { %105 = vmatpush.msra.mxu1 %v50_v15 }
  0x1f   :  { %134 = vmatpush.msra.mxu2 %v50_v15 }
  0x20   :  { %106 = vmatpush.msra.mxu1 %v49_v16 }
  0x21   :  { %135 = vmatpush.msra.mxu2 %v49_v16 }
  0x22   :  { %107 = vmatpush.msra.mxu1 %v48_v0 }
  0x23   :  { %136 = vmatpush.msra.mxu2 %v48_v0 }
  0x24   :  { %108 = vmatpush.msra.mxu1 %v47_v1 }
  0x25   :  { %137 = vmatpush.msra.mxu2 %v47_v1 }
  0x26   :  { %109 = vmatpush.msra.mxu1 %v46_v2 }
  0x27   :  { %138 = vmatpush.msra.mxu2 %v46_v2 }
  0x28   :  { %110 = vmatpush.msra.mxu1 %v45_v5 }
  0x29   :  { %139 = vmatpush.msra.mxu2 %v45_v5 }
  0x2a   :  { %111 = vmatpush.msra.mxu1 %v44_v7 }
  0x2b   :  { %140 = vmatpush.msra.mxu2 %v44_v7 }
  0x2c   :  { %112 = vmatpush.msra.mxu1 %v43_v9 }
  0x2d   :  { %141 = vmatpush.msra.mxu2 %v43_v9 }
  0x94   :  { %v82_v17 = vpop.f32.mrf.mxu0 }
  0x95   :  { %v88_v19 = vand.u32 2147483647, %v82_v17 }
  0x97   :  { %vm89_vm1 = vcmp.gt.f32.partialorder %v88_v19, 1e-06 }
  0x98   :  { %v90_v20 = vsel %vm89_vm1, %v212_v18, 0.0 }
  0x99   :  { %v91_v21 = vadd.f32 %v90_v20, %v82_v17 }
  0x9b   :  { %214 = vtanh.f32 %v91_v21  ;;  %v92_v23 = vand.u32 2147483647, %v91_v21 }
  0x9d   :  { %vm93_vm3 = vcmp.gt.f32.partialorder %v92_v23, 1e-06 }
  0x9e   :  { %vm94_vm4 = vmand %vm93_vm3, %vm87_vm2 }
  0xa1   :  { %v215_v24 = vpop.eup %214 }
  0xa2   :  { %v96_v25 = vsel %vm94_vm4, %v215_v24, %v91_v21 }
  0xa3   :  { %113 = vmatmul.f32.vlgmr.msra.gmra.mxu1 %v96_v25 }
 0x120   :  { %v114_v26 = vpop.f32.mrf.mxu1 }
 0x121   :  { %v117_v27 = vand.u32 2147483647, %v114_v26 }
 0x123   :  { %vm118_vm5 = vcmp.gt.f32.partialorder %v117_v27, 1e-06 }
 0x124   :  { %v119_v28 = vsel %vm118_vm5, %v212_v18, 0.0 }
 0x125   :  { %v120_v29 = vadd.f32 %v119_v28, %v114_v26 }
 0x127   :  { %216 = vtanh.f32 %v120_v29  ;;  %v121_v30 = vand.u32 2147483647, %v120_v29 }
 0x129   :  { %vm122_vm6 = vcmp.gt.f32.partialorder %v121_v30, 1e-06 }
 0x12a   :  { %vm123_vm7 = vmand %vm122_vm6, %vm87_vm2 }
 0x12d   :  { %v217_v31 = vpop.eup %216 }
 0x12e   :  { %v125_v32 = vsel %vm123_vm7, %v217_v31, %v120_v29 }
 0x12f   :  { %142 = vmatmul.f32.vlgmr.msra.gmra.mxu2 %v125_v32 }
 0x1b2   :  { %v143_v33 = vpop.f32.mrf.mxu2 }
 0x1b3   :  { %v146_v34 = vand.u32 2147483647, %v143_v33 }
 0x1b5   :  { %vm147_vm8 = vcmp.gt.f32.partialorder %v146_v34, 1e-06 }
 0x1b6   :  { %v148_v36 = vsel %vm147_vm8, %v212_v18, 0.0 }
 0x1b7   :  { %v149_v37 = vadd.f32 %v148_v36, %v143_v33 }
 0x1b9   :  { %218 = vtanh.f32 %v149_v37  ;;  %v150_v38 = vand.u32 2147483647, %v149_v37 }
 0x1bb   :  { %vm151_vm9 = vcmp.gt.f32.partialorder %v150_v38, 1e-06 }
 0x1bc   :  { %vm152_vm10 = vmand %vm151_vm9, %vm87_vm2 }
 0x1bf   :  { %v219_v42 = vpop.eup %218 }
 0x1c0   :  { %v154_v43 = vsel %vm152_vm10, %v219_v42, %v149_v37 }
 0x1c1   :  { %178 = vmatpush.xpose.msra.mxu3 %v154_v43 }
 0x1c4   :  { %205 = vmatmul.msk.f32.vlgmr.msra.gmra.mxu3 %vm160_vm11, %v302_v44 }
 0x247   :  { %v180_v45 = vpop.f32.mrf.mxu3 }
 0x248   :  { %184 = vst.msk [vmem:[#allocation7] sm:$0xff] %vm183_vm12, %v180_v45 }
 0x249   :  { %195 = dma.vmem_to_hbm [thread:$0]  %s191_s1, 128, %s193_s23, [#allocation4]  }
 0x24a   :  { %296 = dma.done.wait [#allocation4], 128  }
 0x24b   :  { %297 = vsyncadd [#allocation4], 4294967168 }
 0x24c   :  { %200 = vsyncpa [#allocation3], 1 }
 0x24d   :  { %201 = vsyncpa [#allocation6], 1 }
 0x24e   :  { %202 = vsyncpa [#allocation4], 1 }

</bundles_post_ra>
